<compile_context>
chip_gen: v5e
topology: v5e:2x2
jax: 0.10.0
libtpu: 0.0.40
codegen_flags: <defaults>
</compile_context>

<pallas_src>
import jax
import jax.numpy as jnp
from jax.experimental import pallas as pl
from jax.experimental.pallas import tpu as pltpu


def _round_up(a, b):
    return (a + b - 1) // b * b


def _vmem_capacity_bytes():
    """Physical VMEM per core; conservative fallback if the query fails."""
    try:
        info = pltpu.get_tpu_info()
        cap = getattr(info, "vmem_capacity_bytes", None)
        if cap:
            return int(cap)
    except Exception:
        pass
    return 64 * 1024 * 1024  # v7x-sized fallback (most restrictive)


def _estimate_vmem(tm, tk, d_model_p, in_it, out_it, use_scratch):
    est = (2 * tm * d_model_p * in_it          # x tile (double-buffered)
           + 2 * d_model_p * tk * in_it        # w1 chunk
           + 2 * tk * d_model_p * in_it        # w2 chunk
           + 2 * (tk + d_model_p) * 4          # bias chunks (f32)
           + 2 * tm * d_model_p * out_it       # output tile
           + tm * tk * 4)                      # h intermediate (f32)
    if use_scratch:
        est += tm * d_model_p * 4              # f32 accumulator scratch
    return est


def _ffn_kernel(x_ref, w1_ref, b1_ref, w2_ref, b2_ref, o_ref, *scratch):
    # x_ref:  (tm, d_model_p)        w1_ref: (d_model_p, tk)   b1_ref: (1, tk)
    # w2_ref: (tk, d_model_p)        b2_ref: (1, d_model_p)
    # o_ref:  (tm, d_model_p)
    # scratch: () if o_ref is f32 (accumulate in place), else (f32 acc,)
    acc_ref = scratch[0] if scratch else o_ref
    k = pl.program_id(1)

    @pl.when(k == 0)
    def _():
        # Seed the accumulator with the output bias => epilogue is just a cast.
        acc_ref[...] = jnp.broadcast_to(b2_ref[...], acc_ref.shape)

    # First matmul + bias + ReLU for this d_ff chunk (f32 accumulation).
    h = jnp.dot(x_ref[...], w1_ref[...], preferred_element_type=jnp.float32)
    h = jnp.maximum(h + b1_ref[...], 0.0)

    # dropout(p) in eval mode == identity.

    # Second matmul: accumulate this chunk's contribution to the output.
    acc_ref[...] += jnp.dot(h.astype(w2_ref.dtype), w2_ref[...],
                            preferred_element_type=jnp.float32)

    if scratch:
        @pl.when(k == pl.num_programs(1) - 1)
        def _():
            o_ref[...] = acc_ref[...].astype(o_ref.dtype)


def positionwise_ffn(x, w1, b1, w2, b2, *, tm=None, tk=None, compute_dtype=None):
    """FFN forward.

    x:  (..., d_model)
    w1: (d_model, d_ff)   b1: (d_ff,)
    w2: (d_ff, d_model)   b2: (d_model,)
    tm: row tile (multiple of 8);  tk: d_ff chunk (multiple of 128).
        Defaults are generation-aware (bigger on 128 MiB-VMEM chips).
    compute_dtype: optional matmul input dtype (e.g. jnp.bfloat16 on v5e/v6e/
        v7x MXUs); accumulation, bias adds and ReLU stay f32.
    """
    vmem_bytes = _vmem_capacity_bytes()
    big_vmem = vmem_bytes >= 96 * 1024 * 1024       # v5e/v6e (128 MiB) vs v7x (64 MiB)
    vmem_cap = int(0.85 * vmem_bytes)

    if tm is None:
        tm = 1024 if big_vmem else 512
    if tk is None:
        tk = 1024 if big_vmem else 512
    assert tm % 8 == 0 and tk % 128 == 0

    orig_shape = x.shape
    d_model = orig_shape[-1]
    d_ff = w1.shape[1]
    out_dtype = x.dtype
    use_scratch = jnp.dtype(out_dtype) != jnp.dtype(jnp.float32)

    x2d = x.reshape(-1, d_model)
    m = x2d.shape[0]

    if compute_dtype is not None:
        x2d = x2d.astype(compute_dtype)
        w1 = w1.astype(compute_dtype)
        w2 = w2.astype(compute_dtype)

    in_it = jnp.dtype(x2d.dtype).itemsize
    out_it = jnp.dtype(out_dtype).itemsize
    d_model_p = _round_up(d_model, 128)             # lane-dense output stores

    # Effective tiles: shrink to the (aligned) problem size for small shapes.
    tm_eff = min(tm, _round_up(m, 8))
    tk_eff = min(tk, _round_up(d_ff, 128))

    # Small-VMEM chips (v7x) have 2 TensorCores: make sure the "parallel" row
    # axis has >= 2 grid steps when the row count allows it.
    if not big_vmem and _round_up(m, tm_eff) // tm_eff < 2:
        half = _round_up(-(-m // 2), 8)
        if half < tm_eff:
            tm_eff = half

    # Shrink tiles (tk first, then tm) until the estimate fits the VMEM cap,
    # instead of clamping the limit below actual usage.
    while _estimate_vmem(tm_eff, tk_eff, d_model_p, in_it, out_it, use_scratch) > vmem_cap:
        if tk_eff > 128:
            tk_eff = max(128, _round_up(tk_eff // 2, 128))
        elif tm_eff > 8:
            tm_eff = max(8, _round_up(tm_eff // 2, 8))
        else:
            break

    m_p = _round_up(m, tm_eff)
    d_ff_p = _round_up(d_ff, tk_eff)
    n_k = d_ff_p // tk_eff

    # Zero-pad only when needed.  Padded d_model columns / d_ff rows of the
    # weights and padded biases are zero, so padded lanes contribute nothing
    # and are sliced away afterwards.
    pad_m, pad_d, pad_f = m_p - m, d_model_p - d_model, d_ff_p - d_ff
    if pad_m or pad_d:
        x2d = jnp.pad(x2d, ((0, pad_m), (0, pad_d)))
    w1p = jnp.pad(w1, ((0, pad_d), (0, pad_f))) if (pad_d or pad_f) else w1
    w2p = jnp.pad(w2, ((0, pad_f), (0, pad_d))) if (pad_f or pad_d) else w2
    b1p = b1.astype(jnp.float32).reshape(1, d_ff)
    if pad_f:
        b1p = jnp.pad(b1p, ((0, 0), (0, pad_f)))
    b2p = b2.astype(jnp.float32).reshape(1, d_model)
    if pad_d:
        b2p = jnp.pad(b2p, ((0, 0), (0, pad_d)))

    # Chunk-major w1 layout: (n_k, d_model_p, tk) so each per-k weight DMA is
    # a contiguous slab rather than a strided column slice.  For n_k == 1 this
    # is a free reshape.  (In a real model, pre-lay-out the weights once.)
    w1c = w1p.reshape(d_model_p, n_k, tk_eff).transpose(1, 0, 2)

    est = _estimate_vmem(tm_eff, tk_eff, d_model_p, in_it, out_it, use_scratch)
    vmem_limit = int(min(max(int(1.25 * est), 32 * 1024 * 1024), vmem_cap))
    if vmem_limit < est:  # pathological d_model: never set below actual usage
        vmem_limit = int(min(est + (2 << 20), vmem_bytes))

    scratch_shapes = ([pltpu.VMEM((tm_eff, d_model_p), jnp.float32)]
                      if use_scratch else [])

    out = pl.pallas_call(
        _ffn_kernel,
        out_shape=jax.ShapeDtypeStruct((m_p, d_model_p), out_dtype),
        grid_spec=pltpu.PrefetchScalarGridSpec(
            num_scalar_prefetch=0,
            # Row axis first ("parallel"), d_ff reduction last ("arbitrary").
            grid=(m_p // tm_eff, n_k),
            in_specs=[
                pl.BlockSpec((tm_eff, d_model_p), lambda i, k: (i, 0)),        # x rows
                pl.BlockSpec((None, d_model_p, tk_eff), lambda i, k: (k, 0, 0)),  # w1 chunk
                pl.BlockSpec((1, tk_eff), lambda i, k: (0, k)),                # b1 chunk
                pl.BlockSpec((tk_eff, d_model_p), lambda i, k: (k, 0)),        # w2 chunk
                pl.BlockSpec((1, d_model_p), lambda i, k: (0, 0)),             # b2
            ],
            out_specs=pl.BlockSpec((tm_eff, d_model_p), lambda i, k: (i, 0)),
            scratch_shapes=scratch_shapes,
        ),
        compiler_params=pltpu.CompilerParams(
            dimension_semantics=("parallel", "arbitrary"),
            vmem_limit_bytes=vmem_limit),
    )(x2d, w1c, b1p, w2p, b2p)

    if pad_m or pad_d:
        out = out[:m, :d_model]
    return out.reshape(orig_shape)


if __name__ == "__main__":
    # Small shapes consistent with the module: batch=2, seq=8, d_model=32, d_ff=64
    B, S, d_model, d_ff = 2, 8, 32, 64

    key = jax.random.PRNGKey(0)
    kx, kw1, kb1, kw2, kb2 = jax.random.split(key, 5)

    x = jax.random.normal(kx, (B, S, d_model), dtype=jnp.float32)

    # nn.Linear stores weight as (out, in); we keep the math x @ W^T + b by
    # materializing the transposed weights (in, out) directly.
    w1 = jax.random.normal(kw1, (d_model, d_ff), dtype=jnp.float32) * 0.02
    b1 = jax.random.normal(kb1, (d_ff,), dtype=jnp.float32) * 0.02
    w2 = jax.random.normal(kw2, (d_ff, d_model), dtype=jnp.float32) * 0.02
    b2 = jax.random.normal(kb2, (d_model,), dtype=jnp.float32) * 0.02

    ref = jnp.maximum(x @ w1 + b1, 0.0) @ w2 + b2

    # f32 path (matches the torch f32 eval-mode reference tightly).
    y = positionwise_ffn(x, w1, b1, w2, b2)
    jax.block_until_ready(y)
    assert y.shape == x.shape
    assert jnp.allclose(y, ref, atol=1e-5, rtol=1e-5), "f32 path mismatch"

    # bf16 matmul path (MXU-friendly); f32 accumulation => loose tolerance,
    # main error source is truncating the ReLU output to bf16 pre-2nd-matmul.
    y_bf16 = positionwise_ffn(x, w1, b1, w2, b2, compute_dtype=jnp.bfloat16)
    jax.block_until_ready(y_bf16)
    assert jnp.allclose(y_bf16, ref, atol=5e-2, rtol=5e-2), "bf16 path mismatch"

    print("KERNEL_OK")
</pallas_src>

<mosaic_0001>
module attributes {stable_mosaic.version = 11 : i64} {
  func.func @_ffn_kernel(%arg0: i32, %arg1: i32, %arg2: memref<8x128xf32, #tpu.memory_space<vmem>>, %arg3: memref<1x128x128xf32, #tpu.memory_space<vmem>>, %arg4: memref<1x128xf32, #tpu.memory_space<vmem>>, %arg5: memref<128x128xf32, #tpu.memory_space<vmem>>, %arg6: memref<1x128xf32, #tpu.memory_space<vmem>>, %arg7: memref<8x128xf32, #tpu.memory_space<vmem>>) attributes {dimension_semantics = [#tpu.dimension_semantics<parallel>, #tpu.dimension_semantics<arbitrary>], iteration_bounds = array<i64: 2, 1>, scalar_prefetch = 0 : i64, scratch_operands = 0 : i64, tpu.core_type = #tpu.core_type<tc>, window_params = [{transform_indices = @transform_0, window_bounds = array<i64: 8, 128>}, {transform_indices = @transform_1, window_bounds = array<i64: 1, 128, 128>}, {transform_indices = @transform_2, window_bounds = array<i64: 1, 128>}, {transform_indices = @transform_3, window_bounds = array<i64: 128, 128>}, {pipeline_mode = #tpu.pipeline_mode<synchronous>, transform_indices = @transform_4, window_bounds = array<i64: 1, 128>}, {transform_indices = @transform_5, window_bounds = array<i64: 8, 128>}]} {
    %c0_i32 = arith.constant 0 : i32
    %0 = arith.cmpi eq, %arg1, %c0_i32 : i32
    %1 = arith.extui %0 : i1 to i32
    %c0_i32_0 = arith.constant 0 : i32
    %2 = arith.cmpi ne, %1, %c0_i32_0 : i32
    scf.if %2 {
      %c0_15 = arith.constant 0 : index
      %c0_16 = arith.constant 0 : index
      %17 = vector.load %arg6[%c0_15, %c0_16] : memref<1x128xf32, #tpu.memory_space<vmem>>, vector<1x128xf32>
      %18 = vector.shape_cast %17 : vector<1x128xf32> to vector<1x128xf32>
      %19 = vector.broadcast %18 : vector<1x128xf32> to vector<8x128xf32>
      %c0_17 = arith.constant 0 : index
      %c0_18 = arith.constant 0 : index
      %20 = vector.load %arg7[%c0_17, %c0_18] : memref<8x128xf32, #tpu.memory_space<vmem>>, vector<8x128xf32>
      tpu.vector_store %arg7[%c0_17, %c0_18], %19 {strides = array<i32>} : memref<8x128xf32, #tpu.memory_space<vmem>>, vector<8x128xf32>,
    } else {
    }
    %c0 = arith.constant 0 : index
    %c0_1 = arith.constant 0 : index
    %3 = vector.load %arg2[%c0, %c0_1] : memref<8x128xf32, #tpu.memory_space<vmem>>, vector<8x128xf32>
    %c0_2 = arith.constant 0 : index
    %c0_3 = arith.constant 0 : index
    %c0_4 = arith.constant 0 : index
    %4 = vector.load %arg3[%c0_2, %c0_3, %c0_4] : memref<1x128x128xf32, #tpu.memory_space<vmem>>, vector<1x128x128xf32>
    %5 = vector.shape_cast %4 : vector<1x128x128xf32> to vector<128x128xf32>
    %cst = arith.constant dense<0.000000e+00> : vector<8x128xf32>
    %6 = tpu.matmul %3, %5, %cst {dimension_numbers = #tpu.dot_dimension_numbers<[1], [0], [0], [1], [0, 0, 1, 1], [], []>} : vector<8x128xf32>, vector<128x128xf32>, vector<8x128xf32> -> vector<8x128xf32>
    %c0_5 = arith.constant 0 : index
    %c0_6 = arith.constant 0 : index
    %7 = vector.load %arg4[%c0_5, %c0_6] : memref<1x128xf32, #tpu.memory_space<vmem>>, vector<1x128xf32>
    %8 = vector.broadcast %7 : vector<1x128xf32> to vector<8x128xf32>
    %9 = arith.addf %6, %8 : vector<8x128xf32>
    %cst_7 = arith.constant 0.000000e+00 : f32
    %10 = vector.broadcast %cst_7 : f32 to vector<8x128xf32>
    %11 = arith.maximumf %9, %10 : vector<8x128xf32>
    %c0_8 = arith.constant 0 : index
    %c0_9 = arith.constant 0 : index
    %12 = vector.load %arg7[%c0_8, %c0_9] : memref<8x128xf32, #tpu.memory_space<vmem>>, vector<8x128xf32>
    %c0_10 = arith.constant 0 : index
    %c0_11 = arith.constant 0 : index
    %13 = vector.load %arg5[%c0_10, %c0_11] : memref<128x128xf32, #tpu.memory_space<vmem>>, vector<128x128xf32>
    %cst_12 = arith.constant dense<0.000000e+00> : vector<8x128xf32>
    %14 = tpu.matmul %11, %13, %cst_12 {dimension_numbers = #tpu.dot_dimension_numbers<[1], [0], [0], [1], [0, 0, 1, 1], [], []>} : vector<8x128xf32>, vector<128x128xf32>, vector<8x128xf32> -> vector<8x128xf32>
    %15 = arith.addf %12, %14 : vector<8x128xf32>
    %c0_13 = arith.constant 0 : index
    %c0_14 = arith.constant 0 : index
    %16 = vector.load %arg7[%c0_13, %c0_14] : memref<8x128xf32, #tpu.memory_space<vmem>>, vector<8x128xf32>
    tpu.vector_store %arg7[%c0_13, %c0_14], %15 {strides = array<i32>} : memref<8x128xf32, #tpu.memory_space<vmem>>, vector<8x128xf32>,
    return
  }
  func.func @transform_0(%arg0: i32, %arg1: i32) -> (i32, i32) {
    %c0_i32 = arith.constant 0 : i32
    %c0_i32_0 = arith.constant 0 : i32
    return %arg0, %c0_i32 : i32, i32
  }
  func.func @transform_1(%arg0: i32, %arg1: i32) -> (i32, i32, i32) {
    %c0_i32 = arith.constant 0 : i32
    %c0_i32_0 = arith.constant 0 : i32
    %c0_i32_1 = arith.constant 0 : i32
    return %arg1, %c0_i32, %c0_i32_0 : i32, i32, i32
  }
  func.func @transform_2(%arg0: i32, %arg1: i32) -> (i32, i32) {
    %c0_i32 = arith.constant 0 : i32
    %c0_i32_0 = arith.constant 0 : i32
    return %c0_i32, %arg1 : i32, i32
  }
  func.func @transform_3(%arg0: i32, %arg1: i32) -> (i32, i32) {
    %c0_i32 = arith.constant 0 : i32
    %c0_i32_0 = arith.constant 0 : i32
    return %arg1, %c0_i32 : i32, i32
  }
  func.func @transform_4(%arg0: i32, %arg1: i32) -> (i32, i32) {
    %c0_i32 = arith.constant 0 : i32
    %c0_i32_0 = arith.constant 0 : i32
    %c0_i32_1 = arith.constant 0 : i32
    return %c0_i32, %c0_i32_0 : i32, i32
  }
  func.func @transform_5(%arg0: i32, %arg1: i32) -> (i32, i32) {
    %c0_i32 = arith.constant 0 : i32
    %c0_i32_0 = arith.constant 0 : i32
    return %arg0, %c0_i32 : i32, i32
  }
}

</mosaic_0001>

<bundles_post_ra>
// kernel: tpu_custom_call.1
= control target key start
LH: loop header
LB: loop body
LE: loop exit
PB: predicated region body
PF: predicated region fallthrough
CT: control target
= control target key end

     0   :  { %10 = vsyncpa [#allocation3], 0  ;;  %s1011_s0 = inlined_call_operand.hbm [shape: f32[16,128], index: 0, kind: input, shape index: {}]   ;;  %s1012_s1 = inlined_call_operand.hbm [shape: f32[1,128,128], index: 1, kind: input, shape index: {}]   ;;  %s1013_s2 = inlined_call_operand.vmem [shape: f32[1,128], index: 2, kind: input, shape index: {}]   ;;  %s1014_s3 = inlined_call_operand.hbm [shape: f32[128,128], index: 3, kind: input, shape index: {}]   ;;  %s1015_s4 = inlined_call_operand.vmem [shape: f32[1,128], index: 4, kind: input, shape index: {}]   ;;  %s1016_s5 = inlined_call_operand.hbm [shape: f32[16,128], index: 5, kind: output, shape index: {}]  }
   0x1   :  { %12 = vsyncpa [#allocation3 + $0x1], 0 }
   0x2   :  { %13 = vsyncpa [#allocation6], 0 }
   0x3   :  { %14 = vsyncpa [#allocation4], 0 }
   0x4   :  { %16 = vsyncpa [#allocation4 + $0x1], 0  ;;  %s854_s18 = smov 0   ;;  %s856_s19 = smov 0  }
   0x5   :  { %s858_s20 = smov 0   ;;  %s860_s21 = smov 0  }
   0x6   :  { %s862_s22 = smov 0   ;;  %s864_s23 = smov 0  }
   0x7 LB: > { %s537_s24 = sadd.s32 4294967295, %s818_s23   ;;  %p539_p0 = scmp.ge.s32.totalorder %s818_s23, 1  ;;  %s818_s23 = sphi %s864_s23, %s22_s23   ;;  %s814_s22 = sphi %s862_s22, %s1026_s22   ;;  %s810_s21 = sphi %s860_s21, %s1025_s21   ;;  %s806_s20 = sphi %s858_s20, %s1024_s20   ;;  %s802_s19 = sphi %s856_s19, %s1023_s19   ;;  %s798_s18 = sphi %s854_s18, %s1022_s18  }
   0x8   : > { %p888_p1 = scmp.eq.s32.totalorder %s537_s24, 0  ;;  %p190_p2 = scmp.lt.s32.totalorder %s818_s23, 3 }
   0x9   : > { %s204_s28 = sshll.u32 %s1012_s1, 4  ;;  %s820_s30 = smov [#allocation5]   ;;  %s205_s28 = int_to_ptr.hbm [resolvable:$true] %s204_s28 }
   0xa   : > { %p896_p3 = pnand %p539_p0, %p190_p2  ;;  %s206_s6 = sshll.u32 %s820_s30, 4  ;;  %s207_s6 = int_to_ptr.vmem [resolvable:$true] %s206_s6 }
   0xb   : > { %p543_p6 = scmp.ge.s32.totalorder %s818_s23, 2  ;;  %s227_s9 = sshll.u32 %s1014_s3, 4  ;;  %s228_s9 = int_to_ptr.hbm [resolvable:$true] %s227_s9 }
   0xc   : > { %p567_p4 = pneg %p896_p3  ;;  %s821_s10 = smov 128  }
   0xd   : > { %s822_s11 = smov 8   ;;  %s823_s12 = smov [#allocation7]  }
   0xe   : > { %p568_p5 = pnand %p567_p4, %p888_p1  ;;  %s229_s13 = sshll.u32 %s823_s12, 4  ;;  %s230_s13 = int_to_ptr.vmem [resolvable:$true] %s229_s13 }
   0xf   : > { %s34_s14 = sadd.s32 1, %s814_s22  ;;  %s538_s15 = sadd.s32 4294967294, %s818_s23  }
  0x10   : > { %570 = dma.hbm_to_vmem [thread:$0]  (!%p568_p5), %s205_s28, 2048, %s207_s6, [#allocation6], %s821_s10, %s821_s10, %s822_s11  }
  0x11   : > { %573 = dma.hbm_to_vmem [thread:$0]  (!%p568_p5), %s228_s9, 2048, %s230_s13, [#allocation6], %s821_s10, %s821_s10, %s822_s11  }
  0x12   : > { %p36_p7 = scmp.ge.s32.totalorder %s34_s14, 2  ;;  %s41_s16 = sadd.s32 1, %s806_s20 }
  0x13   : > { %p48_p8 = scmp.ne.s32.totalorder %s806_s20, %s802_s19  ;;  %p49_p9 = scmp.eq.s32.totalorder %s818_s23, 0 }
  0x14   : > { %s1028_s14 = smov (%p36_p7, %s34_s14), 0  ;;  %p54_p10 = scmp.ne.s32.totalorder %s802_s19, %s798_s18 }
  0x15   : > { %s38_s17 = ssub.s32 %s814_s22, %s1028_s14  ;;  %p177_p11 = scmp.eq.s32.totalorder %s537_s24, 1 }
  0x16   : > { %p39_p12 = scmp.eq.s32.totalorder %s38_s17, 0  ;;  %p924_p13 = por %p888_p1, %p54_p10 }
  0x17   : > { %p928_p0 = por %p177_p11, %p48_p8  ;;  %p183_p2 = scmp.eq.s32.totalorder %s538_s15, 1 }
  0x18   : > { %s933_s28 = scalar_select %p39_p12, %s806_s20, %s41_s16  }
  0x19   : > { %p50_p4 = por %p49_p9, %p48_p8  ;;  %p935_p5 = por %p183_p2, %p54_p10 }
  0x1a   : > { %s246_s6 = sand.u32 1, %s806_s20   ;;  %s545_s24 = sshll.u32 %s814_s22, 3 }
  0x1b   : > { %p584_p7 = scmp.lt.s32.totalorder %s818_s23, 2  ;;  %s544_s7 = sshll.u32 %s246_s6, 3 }
  0x1c   : > { %s254_s10 = scalar_lea.hbm %s1011_s0, %s545_s24  ;;  %s250_s12 = scalar_lea.vmem [#allocation2], %s544_s7 }
  0x1d   : > { %s256_s11 = sshll.u32 %s254_s10, 4  ;;  %s258_s13 = sshll.u32 %s250_s12, 4  ;;  %s257_s11 = int_to_ptr.hbm [resolvable:$true] %s256_s11  ;;  %s259_s13 = int_to_ptr.vmem [resolvable:$true] %s258_s13 }
  0x1e   : > { %p575_p11 = pnand %p584_p7, %p50_p4  ;;  %s247_s15 = scalar_lea.sflag [#allocation3], %s246_s6 }
  0x1f   : > { %267 = sbr.rel (%p896_p3) target bundleno = 332 (0x14c), region = 40  ;;  %s948_s16 = sand.u32 (!%p896_p3), 1, %s802_s19  }
  0x20   : > { %577 = dma.hbm_to_vmem [thread:$0]  (!%p575_p11), %s257_s11, 128, %s259_s13, %s247_s15  }
  0x21   : > { %s547_s17 = sshll.u32 (!%p896_p3), %s948_s16, 3  ;;  %s270_s24 = scalar_lea.sflag (!%p896_p3), [#allocation3], %s948_s16 }
  0x22   : > { %s954_s7 = scalar_lea.vmem (!%p896_p3), [#allocation2], %s547_s17 }
  0x24   : > { %785 = dma.done.wait (%p924_p13), %s270_s24, 128  }
  0x25   : > { %787 = vsyncadd (%p924_p13), %s270_s24, 4294967168 }
  0x26   : > { %789 = dma.done.wait (%p888_p1), [#allocation6], 4096  }
  0x27   : > { %791 = vsyncadd (%p888_p1), [#allocation6], 4294963200  ;;  %v343_v0 = vld [vmem:[#allocation5 + $0x78] sm:$0xff]  ;;  %v342_v1 = vld [vmem:[#allocation5 + $0x70] sm:$0xff]  ;;  %s552_s26 = sshll.u32 %s810_s21, 3  ;;  %s313_s12 = scalar_lea.vmem [#allocation8], %s547_s17 }
  0x28   : > { %348 = vmatpush.msra.mxu0 %v343_v0  ;;  %v341_v2 = vld [vmem:[#allocation5 + $0x68] sm:$0xff]  ;;  %v340_v3 = vld [vmem:[#allocation5 + $0x60] sm:$0xff]  ;;  %v385_v4 = vld [vmem:[#allocation7 + $0x78] sm:$0xff]  ;;  %s419_s9 = scalar_lea.hbm %s1016_s5, %s552_s26  ;;  %s421_s13 = sshll.u32 %s313_s12, 4  ;;  %s422_s13 = int_to_ptr.vmem [resolvable:$true] %s421_s13 }
  0x29   : > { %v339_v5 = vld [vmem:[#allocation5 + $0x58] sm:$0xff]  ;;  %386 = vmatpush.msra.mxu1 %v385_v4  ;;  %v384_v6 = vld [vmem:[#allocation7 + $0x70] sm:$0xff]  ;;  %v383_v7 = vld [vmem:[#allocation7 + $0x68] sm:$0xff]  ;;  %s423_s15 = sshll.u32 %s419_s9, 4  ;;  %s409_s24 = scalar_lea.sflag [#allocation4], %s948_s16  ;;  %s424_s15 = int_to_ptr.hbm [resolvable:$true] %s423_s15 }
  0x2a   : > { %349 = vmatpush.msra.mxu0 %v342_v1  ;;  %v338_v8 = vld [vmem:[#allocation5 + $0x50] sm:$0xff]  ;;  %v382_v9 = vld [vmem:[#allocation7 + $0x60] sm:$0xff]  ;;  %v337_v10 = vld [vmem:[#allocation5 + $0x48] sm:$0xff]  ;;  %s746_s21 = sshra.s32 %s424_s15, 4  ;;  %s752_s26 = scalar_lea.hbm %s1016_s5, 16  ;;  %s747_s21 = int_to_ptr.hbm [resolvable:$true] %s746_s21 }
  0x2b   : > { %387 = vmatpush.msra.mxu1 %v384_v6  ;;  %v381_v11 = vld [vmem:[#allocation7 + $0x58] sm:$0xff]  ;;  %v336_v12 = vld [vmem:[#allocation5 + $0x40] sm:$0xff]  ;;  %v380_v13 = vld [vmem:[#allocation7 + $0x50] sm:$0xff]  ;;  %p753_p9 = scmp.lt.s32.totalorder %s747_s21, %s1016_s5 }
  0x2c   : > { %350 = vmatpush.msra.mxu0 %v341_v2  ;;  %v335_v14 = vld [vmem:[#allocation5 + $0x38] sm:$0xff]  ;;  %v379_v15 = vld [vmem:[#allocation7 + $0x48] sm:$0xff]  ;;  %v334_v16 = vld [vmem:[#allocation5 + $0x30] sm:$0xff] }
  0x2d   : > { %388 = vmatpush.msra.mxu1 %v383_v7  ;;  %v378_v17 = vld [vmem:[#allocation7 + $0x40] sm:$0xff]  ;;  %v333_v18 = vld [vmem:[#allocation5 + $0x28] sm:$0xff]  ;;  %v377_v19 = vld [vmem:[#allocation7 + $0x38] sm:$0xff] }
  0x2e   : > { %351 = vmatpush.msra.mxu0 %v340_v3  ;;  %v332_v20 = vld [vmem:[#allocation5 + $0x20] sm:$0xff]  ;;  %v376_v21 = vld [vmem:[#allocation7 + $0x30] sm:$0xff]  ;;  %v331_v22 = vld [vmem:[#allocation5 + $0x18] sm:$0xff] }
  0x2f   : > { %389 = vmatpush.msra.mxu1 %v382_v9  ;;  %v375_v23 = vld [vmem:[#allocation7 + $0x28] sm:$0xff]  ;;  %v330_v24 = vld [vmem:[#allocation5 + $0x10] sm:$0xff]  ;;  %v374_v25 = vld [vmem:[#allocation7 + $0x20] sm:$0xff] }
  0x30   : > { %352 = vmatpush.msra.mxu0 %v339_v5  ;;  %v329_v26 = vld [vmem:[#allocation5 + $0x8] sm:$0xff]  ;;  %v373_v27 = vld [vmem:[#allocation7 + $0x18] sm:$0xff]  ;;  %v328_v28 = vld [vmem:[#allocation5] sm:$0xff] }
  0x31   : > { %390 = vmatpush.msra.mxu1 %v381_v11  ;;  %v327_v29 = vld [vmem:[%s954_s7] sm:$0xff]  ;;  %v371_v31 = vld [vmem:[#allocation7 + $0x8] sm:$0xff]  ;;  %v370_v32 = vld [vmem:[#allocation7] sm:$0xff]  ;;  %s748_s7 = scalar_lea.hbm %s747_s21, 8 }
  0x32   : > { %353 = vmatpush.msra.mxu0 %v338_v8  ;;  %v372_v30 = vld [vmem:[#allocation7 + $0x10] sm:$0xff]  ;;  %p749_p1 = scmp.ne.s32.totalorder %s747_s21, %s748_s7  ;;  %p754_p10 = scmp.lt.s32.totalorder %s752_s26, %s748_s7 }
  0x33   : > { %391 = vmatpush.msra.mxu1 %v380_v13  ;;  %v640_v33 = vld [vmem:[%s1013_s2] ss:$0 sm:$0xff] }
  0x34   : > { %354 = vmatpush.msra.mxu0 %v337_v10  ;;  %v641_v37 = vld [vmem:[%s1015_s4] ss:$0 sm:$0xff]  ;;  %p750_p3 = pnand %p749_p1, %p928_p0  ;;  %p755_p12 = por %p754_p10, %p753_p9 }
  0x35   : > { %392 = vmatpush.msra.mxu1 %v379_v15 }
  0x36   : > { %355 = vmatpush.msra.mxu0 %v336_v12  ;;  %p751_p8 = pneg %p750_p3 }
  0x37   : > { %393 = vmatpush.msra.mxu1 %v378_v17 }
  0x38   : > { %356 = vmatpush.msra.mxu0 %v335_v14  ;;  %p756_p13 = pnand %p755_p12, %p751_p8 }
  0x39   : > { %394 = vmatpush.msra.mxu1 %v377_v19 }
  0x3a   : > { %357 = vmatpush.msra.mxu0 %v334_v16 }
  0x3b   : > { %395 = vmatpush.msra.mxu1 %v376_v21 }
  0x3c   : > { %358 = vmatpush.msra.mxu0 %v333_v18 }
  0x3d   : > { %396 = vmatpush.msra.mxu1 %v375_v23 }
  0x3e   : > { %359 = vmatpush.msra.mxu0 %v332_v20 }
  0x3f   : > { %397 = vmatpush.msra.mxu1 %v374_v25 }
  0x40   : > { %360 = vmatpush.msra.mxu0 %v331_v22 }
  0x41   : > { %398 = vmatpush.msra.mxu1 %v373_v27 }
  0x42   : > { %361 = vmatpush.msra.mxu0 %v330_v24 }
  0x43   : > { %399 = vmatpush.msra.mxu1 %v372_v30 }
  0x44   : > { %362 = vmatpush.msra.mxu0 %v329_v26 }
  0x45   : > { %400 = vmatpush.msra.mxu1 %v371_v31 }
  0x46   : > { %363 = vmatpush.msra.mxu0 %v328_v28 }
  0x47   : > { %364 = vmatmul.f32.vlgmr.msra.gmra.mxu0 %v327_v29  ;;  %401 = vmatpush.msra.mxu1 %v370_v32 }
  0xc4   : > { %v365_v34 = vpop.f32.mrf.mxu0 }
  0xc5   : > { %v366_v35 = vadd.f32 %v640_v33, %v365_v34 }
  0xc7   : > { %v368_v36 = vmax.f32 %v366_v35, 0.0 }
  0xc9   : > { %402 = vmatmul.f32.vlgmr.msra.gmra.mxu1 %v368_v36 }
 0x146   : > { %v403_v38 = vpop.f32.mrf.mxu1 }
 0x147   : > { %v406_v39 = vadd.f32 %v641_v37, %v403_v38 }
 0x149   : > { %407 = vst [vmem:[%s313_s12] sm:$0xff] %v406_v39 }
 0x14a   : > { %759 = shalt.err (!%p756_p13)
}
 0x14b   : > { %565 = dma.vmem_to_hbm [thread:$0]  (%p928_p0), %s422_s13, 128, %s424_s15, %s409_s24  }
 0x14c PF: > { %s435_s16 = sand.u32 1, %s798_s18   ;;  %p579_p2 = pnand %p543_p6, %p935_p5 }
 0x14d   : > { %s436_s8 = scalar_lea.sflag [#allocation4], %s435_s16 }
 0x14e   : > { %p580_p4 = pneg %p579_p2 }
 0x150   : > { %793 = dma.done.wait (%p580_p4), %s436_s8, 128  }
 0x151   : > { %795 = vsyncadd (%p580_p4), %s436_s8, 4294967168  ;;  %s22_s23 = sadd.s32 1, %s818_s23   ;;  %s1022_s18 = smov %s802_s19 }
 0x152   : > { %p19_p7 = scmp.ge.s32.totalorder %s22_s23, 4   ;;  %s1023_s19 = smov %s806_s20 }
 0x153   : > { %s1024_s20 = smov %s933_s28  ;;  %s1025_s21 = smov %s814_s22 }
 0x154   : > { %s1026_s22 = smov %s1028_s14  ;;  %21 = sbr.rel (!%p19_p7) target bundleno = 7 (0x7), region = 102 }
 0x159   :  { %442 = vsyncpa [#allocation3], 1 }
 0x15a   :  { %444 = vsyncpa [#allocation3 + $0x1], 1 }
 0x15b   :  { %445 = vsyncpa [#allocation6], 1 }
 0x15c   :  { %446 = vsyncpa [#allocation4], 1 }
 0x15d   :  { %448 = vsyncpa [#allocation4 + $0x1], 1 }

</bundles_post_ra>
